<compile_context>
chip_gen: v7x
topology: tpu7x:2x2x1
jax: 0.10.0
libtpu: 0.0.40
codegen_flags: <defaults>
</compile_context>

<pallas_src>
import jax
import jax.numpy as jnp
from jax.experimental import pallas as pl
from jax.experimental.pallas import tpu as pltpu

_LANE = 128


def _make_fused_mlp_kernel(depth):
    """Kernel over one (batch, pixel-tile) block with all `depth` layers fused."""

    def kernel(x_ref, *refs):
        # x_ref : (1, Cin0, t_pix)   input pixel tile (channels x lanes)
        # refs  : (w0, b0, w1, b1, ..., o_ref)
        #   w_l : (Cout_l, Cin_l)    resident weight
        #   b_l : (Cout_l, 1)        resident bias column
        # o_ref : (1, Cout, t_pix)
        o_ref = refs[-1]
        h = x_ref[0].astype(jnp.float32)                       # (Cin0, t_pix)
        for l in range(depth):
            w = refs[2 * l][...].astype(jnp.float32)           # (Cout_l, Cin_l)
            b = refs[2 * l + 1][...].astype(jnp.float32)       # (Cout_l, 1)
            h = jnp.dot(w, h, preferred_element_type=jnp.float32)
            h = jnp.maximum(h + b, 0.0)                        # bias bcast + ReLU
        o_ref[0] = h.astype(o_ref.dtype)

    return kernel


def _vmem_budget_bytes():
    """Generation-aware usable-VMEM budget (leave 25% headroom for the compiler)."""
    try:
        cap = int(pltpu.get_tpu_info().vmem_capacity_bytes)
    except Exception:
        cap = 64 * 1024 * 1024   # conservative: v7x per-TensorCore VMEM
    return (cap * 3) // 4


def _choose_t_pix(HW, Cin, Cout_max, N, vmem_budget):
    """Lane-tile size: big enough to amortize per-step overhead, bounded by VMEM,
    and leaving >= 2 grid points for v7x megacore when pixels allow it."""
    hw_tiles = pl.cdiv(HW, _LANE)
    # Target ~2 MiB of combined in+out HBM traffic per grid step.
    bytes_per_lane = 4 * (Cin + Cout_max)
    target_step_bytes = 2 * 1024 * 1024
    t_tiles = max(1, target_step_bytes // (bytes_per_lane * _LANE))
    t_tiles = min(t_tiles, hw_tiles)
    # VMEM cap (f32): 2 input bufs + 2 output bufs + 1 intermediate, 2x headroom.
    per_tile_bytes = 4 * _LANE * (2 * Cin + 3 * Cout_max)
    t_tiles = max(1, min(t_tiles, vmem_budget // (2 * per_tile_bytes)))
    # Megacore balance (v7x has 2 TCs): keep total grid >= 2 when possible.
    while t_tiles > 1 and N * pl.cdiv(hw_tiles, t_tiles) < 2:
        t_tiles //= 2
    return t_tiles * _LANE


@jax.jit
def mlp_block_forward(x_nchw, params):
    """Forward pass of MlpBlock: repeated (1x1 conv + ReLU), fused in one kernel.

    x_nchw: (N, C, H, W) float32
    params: list of (w, b) with w: (Cout, Cin)  [PyTorch conv weight squeezed],
            b: (Cout,)
    """
    N, C, H, W = x_nchw.shape
    depth = len(params)
    Cout = params[-1][0].shape[0]
    Cmax = max(w.shape[0] for w, _ in params)
    HW = H * W

    budget = _vmem_budget_bytes()
    t_pix = _choose_t_pix(HW, C, Cmax, N, budget)
    grid = (N, pl.cdiv(HW, t_pix))           # ragged last tile handled by Pallas

    x3d = x_nchw.reshape(N, C, HW)            # NCHW consumed directly, no transpose

    in_specs = [pl.BlockSpec((1, C, t_pix), lambda n, p: (n, 0, p))]
    wb_args = []
    for (w, b) in params:
        co, ci = w.shape
        in_specs.append(pl.BlockSpec((co, ci), lambda n, p: (0, 0)))   # resident
        in_specs.append(pl.BlockSpec((co, 1), lambda n, p: (0, 0)))    # resident
        wb_args.append(w)
        wb_args.append(b.reshape(co, 1))

    # Actual VMEM footprint (f32): double-buffered in/out tiles + intermediate
    # activation + double-buffered (tiny) weights/biases; request 2x headroom,
    # clamped to the generation budget.
    footprint = 4 * t_pix * (2 * C + 2 * Cout + Cmax)
    footprint += 2 * sum(4 * (w.size + b.size) for w, b in params)
    vmem_limit = int(min(budget, max(2 * footprint, 16 * 1024 * 1024)))

    out = pl.pallas_call(
        _make_fused_mlp_kernel(depth),
        out_shape=jax.ShapeDtypeStruct((N, Cout, HW), x_nchw.dtype),
        grid_spec=pltpu.PrefetchScalarGridSpec(
            num_scalar_prefetch=0,
            grid=grid,
            in_specs=in_specs,
            out_specs=pl.BlockSpec((1, Cout, t_pix), lambda n, p: (n, 0, p)),
        ),
        compiler_params=pltpu.CompilerParams(
            dimension_semantics=("parallel", "parallel"),
            vmem_limit_bytes=vmem_limit,
        ),
    )(x3d, *wb_args)

    return out.reshape(N, Cout, H, W)


def init_mlp_block_params(key, in_features, out_features, depth_of_mlp):
    """Deterministic parameter init mimicking nn.Conv2d defaults
    (kaiming-uniform weight, uniform bias with bound 1/sqrt(fan_in)).
    Weights stored as (Cout, Cin) = PyTorch (Cout, Cin, 1, 1) squeezed."""
    params = []
    cin = in_features
    for _ in range(depth_of_mlp):
        key, kw, kb = jax.random.split(key, 3)
        fan_in = cin  # 1x1 kernel -> fan_in = Cin
        w_bound = jnp.sqrt(6.0 / fan_in)
        b_bound = 1.0 / jnp.sqrt(fan_in)
        w = jax.random.uniform(kw, (out_features, cin), jnp.float32,
                               minval=-w_bound, maxval=w_bound)
        b = jax.random.uniform(kb, (out_features,), jnp.float32,
                               minval=-b_bound, maxval=b_bound)
        params.append((w, b))
        cin = out_features
    return params


def _reference_forward(x_nchw, params):
    N, C, H, W = x_nchw.shape
    out = x_nchw.reshape(N, C, H * W)
    for (w, b) in params:
        out = jnp.maximum(jnp.einsum('oi,nip->nop', w, out) + b[None, :, None], 0.0)
    Cout = params[-1][0].shape[0]
    return out.reshape(N, Cout, H, W)


if __name__ == "__main__":
    key = jax.random.PRNGKey(0)
    k_x, k_p = jax.random.split(key)

    N, C_in, H, W = 2, 4, 16, 16
    C_out, depth = 32, 3

    x = jax.random.normal(k_x, (N, C_in, H, W), jnp.float32)
    params = init_mlp_block_params(k_p, C_in, C_out, depth)

    y = mlp_block_forward(x, params)
    jax.block_until_ready(y)

    y_ref = _reference_forward(x, params)
    assert y.shape == (N, C_out, H, W)
    assert jnp.allclose(y, y_ref, atol=1e-5, rtol=1e-5)

    print("KERNEL_OK")
</pallas_src>

<mosaic_0001>
module attributes {stable_mosaic.version = 11 : i64} {
  func.func @kernel(%arg0: i32, %arg1: i32, %arg2: memref<1x4x256xf32, #tpu.memory_space<vmem>>, %arg3: memref<32x4xf32, #tpu.memory_space<vmem>>, %arg4: memref<32x1xf32, #tpu.memory_space<vmem>>, %arg5: memref<32x32xf32, #tpu.memory_space<vmem>>, %arg6: memref<32x1xf32, #tpu.memory_space<vmem>>, %arg7: memref<32x32xf32, #tpu.memory_space<vmem>>, %arg8: memref<32x1xf32, #tpu.memory_space<vmem>>, %arg9: memref<1x32x256xf32, #tpu.memory_space<vmem>>) attributes {dimension_semantics = [#tpu.dimension_semantics<parallel>, #tpu.dimension_semantics<parallel>], iteration_bounds = array<i64: 2, 1>, scalar_prefetch = 0 : i64, scratch_operands = 0 : i64, tpu.core_type = #tpu.core_type<tc>, window_params = [{transform_indices = @transform_0, window_bounds = array<i64: 1, 4, 256>}, {pipeline_mode = #tpu.pipeline_mode<synchronous>, transform_indices = @transform_1, window_bounds = array<i64: 32, 4>}, {pipeline_mode = #tpu.pipeline_mode<synchronous>, transform_indices = @transform_2, window_bounds = array<i64: 32, 1>}, {pipeline_mode = #tpu.pipeline_mode<synchronous>, transform_indices = @transform_3, window_bounds = array<i64: 32, 32>}, {pipeline_mode = #tpu.pipeline_mode<synchronous>, transform_indices = @transform_4, window_bounds = array<i64: 32, 1>}, {pipeline_mode = #tpu.pipeline_mode<synchronous>, transform_indices = @transform_5, window_bounds = array<i64: 32, 32>}, {pipeline_mode = #tpu.pipeline_mode<synchronous>, transform_indices = @transform_6, window_bounds = array<i64: 32, 1>}, {transform_indices = @transform_7, window_bounds = array<i64: 1, 32, 256>}]} {
    %c0 = arith.constant 0 : index
    %c0_0 = arith.constant 0 : index
    %c0_1 = arith.constant 0 : index
    %0 = vector.load %arg2[%c0, %c0_0, %c0_1] : memref<1x4x256xf32, #tpu.memory_space<vmem>>, vector<1x4x256xf32>
    %1 = vector.shape_cast %0 : vector<1x4x256xf32> to vector<4x256xf32>
    %c0_2 = arith.constant 0 : index
    %c0_3 = arith.constant 0 : index
    %2 = vector.load %arg3[%c0_2, %c0_3] : memref<32x4xf32, #tpu.memory_space<vmem>>, vector<32x4xf32>
    %c0_4 = arith.constant 0 : index
    %c0_5 = arith.constant 0 : index
    %3 = vector.load %arg4[%c0_4, %c0_5] : memref<32x1xf32, #tpu.memory_space<vmem>>, vector<32x1xf32>
    %cst = arith.constant dense<0.000000e+00> : vector<32x256xf32>
    %4 = tpu.matmul %2, %1, %cst {dimension_numbers = #tpu.dot_dimension_numbers<[1], [0], [0], [1], [0, 0, 1, 1], [], []>} : vector<32x4xf32>, vector<4x256xf32>, vector<32x256xf32> -> vector<32x256xf32>
    %5 = vector.broadcast %3 : vector<32x1xf32> to vector<32x256xf32>
    %6 = arith.addf %4, %5 : vector<32x256xf32>
    %cst_6 = arith.constant 0.000000e+00 : f32
    %7 = vector.broadcast %cst_6 : f32 to vector<32x256xf32>
    %8 = arith.maximumf %6, %7 : vector<32x256xf32>
    %c0_7 = arith.constant 0 : index
    %c0_8 = arith.constant 0 : index
    %9 = vector.load %arg5[%c0_7, %c0_8] : memref<32x32xf32, #tpu.memory_space<vmem>>, vector<32x32xf32>
    %c0_9 = arith.constant 0 : index
    %c0_10 = arith.constant 0 : index
    %10 = vector.load %arg6[%c0_9, %c0_10] : memref<32x1xf32, #tpu.memory_space<vmem>>, vector<32x1xf32>
    %cst_11 = arith.constant dense<0.000000e+00> : vector<32x256xf32>
    %11 = tpu.matmul %9, %8, %cst_11 {dimension_numbers = #tpu.dot_dimension_numbers<[1], [0], [0], [1], [0, 0, 1, 1], [], []>} : vector<32x32xf32>, vector<32x256xf32>, vector<32x256xf32> -> vector<32x256xf32>
    %12 = vector.broadcast %10 : vector<32x1xf32> to vector<32x256xf32>
    %13 = arith.addf %11, %12 : vector<32x256xf32>
    %cst_12 = arith.constant 0.000000e+00 : f32
    %14 = vector.broadcast %cst_12 : f32 to vector<32x256xf32>
    %15 = arith.maximumf %13, %14 : vector<32x256xf32>
    %c0_13 = arith.constant 0 : index
    %c0_14 = arith.constant 0 : index
    %16 = vector.load %arg7[%c0_13, %c0_14] : memref<32x32xf32, #tpu.memory_space<vmem>>, vector<32x32xf32>
    %c0_15 = arith.constant 0 : index
    %c0_16 = arith.constant 0 : index
    %17 = vector.load %arg8[%c0_15, %c0_16] : memref<32x1xf32, #tpu.memory_space<vmem>>, vector<32x1xf32>
    %cst_17 = arith.constant dense<0.000000e+00> : vector<32x256xf32>
    %18 = tpu.matmul %16, %15, %cst_17 {dimension_numbers = #tpu.dot_dimension_numbers<[1], [0], [0], [1], [0, 0, 1, 1], [], []>} : vector<32x32xf32>, vector<32x256xf32>, vector<32x256xf32> -> vector<32x256xf32>
    %19 = vector.broadcast %17 : vector<32x1xf32> to vector<32x256xf32>
    %20 = arith.addf %18, %19 : vector<32x256xf32>
    %cst_18 = arith.constant 0.000000e+00 : f32
    %21 = vector.broadcast %cst_18 : f32 to vector<32x256xf32>
    %22 = arith.maximumf %20, %21 : vector<32x256xf32>
    %c0_19 = arith.constant 0 : index
    %c0_20 = arith.constant 0 : index
    %c0_21 = arith.constant 0 : index
    %23 = vector.load %arg9[%c0_19, %c0_20, %c0_21] : memref<1x32x256xf32, #tpu.memory_space<vmem>>, vector<1x32x256xf32>
    %24 = vector.shape_cast %23 : vector<1x32x256xf32> to vector<32x256xf32>
    %25 = vector.shape_cast %22 : vector<32x256xf32> to vector<1x32x256xf32>
    tpu.vector_store %arg9[%c0_19, %c0_20, %c0_21], %25 {strides = array<i32>} : memref<1x32x256xf32, #tpu.memory_space<vmem>>, vector<1x32x256xf32>,
    return
  }
  func.func @transform_0(%arg0: i32, %arg1: i32) -> (i32, i32, i32) {
    %c0_i32 = arith.constant 0 : i32
    %c0_i32_0 = arith.constant 0 : i32
    return %arg0, %c0_i32, %arg1 : i32, i32, i32
  }
  func.func @transform_1(%arg0: i32, %arg1: i32) -> (i32, i32) {
    %c0_i32 = arith.constant 0 : i32
    %c0_i32_0 = arith.constant 0 : i32
    %c0_i32_1 = arith.constant 0 : i32
    return %c0_i32, %c0_i32_0 : i32, i32
  }
  func.func @transform_2(%arg0: i32, %arg1: i32) -> (i32, i32) {
    %c0_i32 = arith.constant 0 : i32
    %c0_i32_0 = arith.constant 0 : i32
    %c0_i32_1 = arith.constant 0 : i32
    return %c0_i32, %c0_i32_0 : i32, i32
  }
  func.func @transform_3(%arg0: i32, %arg1: i32) -> (i32, i32) {
    %c0_i32 = arith.constant 0 : i32
    %c0_i32_0 = arith.constant 0 : i32
    %c0_i32_1 = arith.constant 0 : i32
    return %c0_i32, %c0_i32_0 : i32, i32
  }
  func.func @transform_4(%arg0: i32, %arg1: i32) -> (i32, i32) {
    %c0_i32 = arith.constant 0 : i32
    %c0_i32_0 = arith.constant 0 : i32
    %c0_i32_1 = arith.constant 0 : i32
    return %c0_i32, %c0_i32_0 : i32, i32
  }
  func.func @transform_5(%arg0: i32, %arg1: i32) -> (i32, i32) {
    %c0_i32 = arith.constant 0 : i32
    %c0_i32_0 = arith.constant 0 : i32
    %c0_i32_1 = arith.constant 0 : i32
    return %c0_i32, %c0_i32_0 : i32, i32
  }
  func.func @transform_6(%arg0: i32, %arg1: i32) -> (i32, i32) {
    %c0_i32 = arith.constant 0 : i32
    %c0_i32_0 = arith.constant 0 : i32
    %c0_i32_1 = arith.constant 0 : i32
    return %c0_i32, %c0_i32_0 : i32, i32
  }
  func.func @transform_7(%arg0: i32, %arg1: i32) -> (i32, i32, i32) {
    %c0_i32 = arith.constant 0 : i32
    %c0_i32_0 = arith.constant 0 : i32
    return %arg0, %c0_i32, %arg1 : i32, i32, i32
  }
}

</mosaic_0001>

<bundles_post_ra>
// kernel: mlp_block_forward.1
= control target key start
LH: loop header
LB: loop body
LE: loop exit
PB: predicated region body
PF: predicated region fallthrough
CT: control target
= control target key end

     0   :  { %s974_s24 = smov 0   ;;  %s976_s25 = smov 0   ;;  %s1117_s0 = inlined_call_operand.vmem [shape: f32[2,4,256], index: 0, kind: input, shape index: {}]   ;;  %s1118_s1 = inlined_call_operand.vmem [shape: f32[32,4], index: 1, kind: input, shape index: {}]   ;;  %s1119_s2 = inlined_call_operand.vmem [shape: f32[32,1], index: 2, kind: input, shape index: {}]   ;;  %s1120_s3 = inlined_call_operand.vmem [shape: f32[32,32], index: 3, kind: input, shape index: {}]   ;;  %s1121_s4 = inlined_call_operand.vmem [shape: f32[32,1], index: 4, kind: input, shape index: {}]   ;;  %s1122_s5 = inlined_call_operand.vmem [shape: f32[32,32], index: 5, kind: input, shape index: {}]   ;;  %s1123_s6 = inlined_call_operand.vmem [shape: f32[32,1], index: 6, kind: input, shape index: {}]   ;;  %s1124_s7 = inlined_call_operand.vmem [shape: f32[2,32,256], index: 7, kind: output, shape index: {}]  }
   0x1   :  { %s978_s26 = smov 0  }
   0x2 LB: > { %s29_s27 = sadd.s32 1, %s926_s25  ;;  %p838_p0 = scmp.ge.s32.totalorder %s930_s26, 1  ;;  %s930_s26 = sphi %s978_s26, %s17_s26   ;;  %s926_s25 = sphi %s976_s25, %s1126_s25   ;;  %s922_s24 = sphi %s974_s24, %s1125_s24  }
   0x3   : > { %p31_p1 = scmp.ge.s32.totalorder %s29_s27, 2  ;;  %p258_p2 = scmp.lt.s32.totalorder %s930_s26, 3 }
   0x5   : > { %s1128_s27 = smov (%p31_p1, %s29_s27), 0  ;;  %p259_p3 = pnand %p838_p0, %p258_p2 }
   0x6   : > { %p299_p4 = scmp.lt.s32.totalorder (!%p259_p3), %s922_s24, 1  ;;  %v932_v0 = vmov (!%p259_p3), 0.0   ;;  %v323_v1 = vld [vmem:[%s1119_s2] sm:$0xff] (!%p259_p3)  ;;  %v933_v2 = vmov (!%p259_p3), 0   ;;  %v325_v3 = vld [vmem:[%s1119_s2 + $0x10] sm:$0xff] (!%p259_p3)  ;;  %v324_v4 = vld [vmem:[%s1119_s2 + $0x8] sm:$0xff] (!%p259_p3) }
   0x7   : > { %262 = sbr.rel (%p259_p3) target bundleno = 718 (0x2ce), region = 48  ;;  %431 = vmatprep.mubr.f32.mxu0 (!%p259_p3), %v932_v0  ;;  %443 = vmatprep.mubr.f32.mxu1 (!%p259_p3), %v932_v0  ;;  %v326_v5 = vld [vmem:[%s1119_s2 + $0x18] sm:$0xff] (!%p259_p3)  ;;  %vm362_vm0 = vcmask (!%p259_p3), 1043456   ;;  %v319_v8 = vld [vmem:[%s1118_s1] sm:$0xff] (!%p259_p3)  ;;  %vm349_vm1 = vcmask (!%p259_p3), 31744   ;;  %v321_v9 = vld [vmem:[%s1118_s1 + $0x10] sm:$0xff] (!%p259_p3) }
   0x8   : > { %905 = vset.pattern.permute.xlu0 (!%p259_p3), %v933_v2  ;;  %906 = vset.pattern.permute.xlu1 (!%p259_p3), %v933_v2  ;;  %v468_v10 = vld [vmem:[%s1121_s4] sm:$0xff] (!%p259_p3)  ;;  %v469_v11 = vld [vmem:[%s1121_s4 + $0x8] sm:$0xff] (!%p259_p3)  ;;  %v322_v13 = vld [vmem:[%s1118_s1 + $0x18] sm:$0xff] (!%p259_p3)  ;;  %vm492_vm2 = vcmask (!%p259_p3), 261120  }
   0x9   : > { %329 = vperm.xlu0 (!%p259_p3), %905, %v323_v1   ;;  %339 = vperm.xlu1 (!%p259_p3), %906, %v325_v3   ;;  %v320_v12 = vld [vmem:[%s1118_s1 + $0x8] sm:$0xff] (!%p259_p3)  ;;  %v470_v14 = vld [vmem:[%s1121_s4 + $0x10] sm:$0xff] (!%p259_p3)  ;;  %v471_v15 = vld [vmem:[%s1121_s4 + $0x18] sm:$0xff] (!%p259_p3) }
   0xa   : > { %v606_v16 = vld [vmem:[%s1123_s6] sm:$0xff] (!%p259_p3)  ;;  %v607_v17 = vld [vmem:[%s1123_s6 + $0x8] sm:$0xff] (!%p259_p3)  ;;  %v608_v18 = vld [vmem:[%s1123_s6 + $0x10] sm:$0xff] (!%p259_p3) }
   0xb   : > { %v609_v19 = vld [vmem:[%s1123_s6 + $0x18] sm:$0xff] (!%p259_p3)  ;;  %v464_v52 = vld [vmem:[%s1120_s3] sm:$0xff] (!%p259_p3)  ;;  %v465_v53 = vld [vmem:[%s1120_s3 + $0x8] sm:$0xff] (!%p259_p3) }
   0xc   : > { %v466_v54 = vld [vmem:[%s1120_s3 + $0x10] sm:$0xff] (!%p259_p3)  ;;  %v467_v55 = vld [vmem:[%s1120_s3 + $0x18] sm:$0xff] (!%p259_p3) }
   0xd   : > { %334 = vperm.xlu0 (!%p259_p3), %905, %v324_v4   ;;  %344 = vperm.xlu1 (!%p259_p3), %906, %v326_v5  }
   0xe   : > { %s1130_s24 = smov (!%p299_p4, %s922_s24), 1 }
   0xf   : > { %s859_s9 = sshll.u32 %s1130_s24, 3  ;;  %s860_s19 = sshll.u32 %s1130_s24, 6 }
  0x10   : > { %s306_s16 = scalar_lea.vmem %s1117_s0, %s859_s9  ;;  %s1098_s22 = scalar_lea.vmem %s1124_s7, %s860_s19 }
  0x11   : > { %v318_v6 = vld [vmem:[%s306_s16] sm:$0xff]  ;;  %474 = vperm.xlu0 %905, %v468_v10   ;;  %479 = vperm.xlu1 %906, %v469_v11  }
  0x12   : > { %v348_v7 = vcombine.high %v318_v6, %v318_v6 }
  0x14   : > { %843 = vmatprep.subr.msk.mxu0 %vm362_vm0, %v348_v7  ;;  %877 = vmatprep.subr.msk.mxu1 %vm362_vm0, %v348_v7 }
  0x15   : > { %844 = vmatpush1.msk.msra.mxu0 %vm362_vm0, %v318_v6  ;;  %878 = vmatpush1.msk.msra.mxu1 %vm362_vm0, %v318_v6 }
  0x16   : > { %845 = vmatmul.mubr.msk.f32.vlgmr.msra.gmra.mrb[0].mxu0 %vm349_vm1, %v319_v8  ;;  %847 = vmatmul.mubr.msk.f32.vlgmr.msra.gmra.mrb[0].mxu1 %vm349_vm1, %v321_v9 }
  0x17   : > { %437 = vmatprep.mubr.f32.mxu0 %v932_v0  ;;  %449 = vmatprep.mubr.f32.mxu1 %v932_v0 }
  0x18   : > { %484 = vperm.xlu0 %905, %v470_v14   ;;  %489 = vperm.xlu1 %906, %v471_v15  }
  0x1a   : > { %846 = vmatmul.mubr.msk.f32.gmra.mrb[2].mxu0 %vm349_vm1, %v320_v12  ;;  %848 = vmatmul.mubr.msk.f32.gmra.mrb[2].mxu1 %vm349_vm1, %v322_v13 }
  0x1b   : > { %569 = vmatprep.mubr.f32.mxu1 %v932_v0  ;;  %706 = vmatprep.mubr.f32.mxu0 %v932_v0 }
  0x1c   : > { %612 = vperm.xlu0 %905, %v606_v16   ;;  %617 = vperm.xlu1 %906, %v607_v17  }
  0x20   : > { %622 = vperm.xlu0 %905, %v608_v18   ;;  %627 = vperm.xlu1 %906, %v609_v19  }
  0x88   : > { %v330_v20 = vpop.permute.xlu0 %329  ;;  %v340_v21 = vpop.permute.xlu1 %339 }
  0x8c   : > { %v335_v28 = vpop.permute.xlu0 %334  ;;  %v345_v29 = vpop.permute.xlu1 %344 }
  0x90   : > { %v475_v58 = vpop.permute.xlu0 %474  ;;  %v480_v60 = vpop.permute.xlu1 %479 }
  0x97   : > { %v485_v10 = vpop.permute.xlu0 %484  ;;  %v490_v13 = vpop.permute.xlu1 %489 }
  0xe9   : > { %v433_v22 = vpop.f32.mrb[0].mxu0  ;;  %v445_v23 = vpop.f32.mrb[0].mxu1 }
  0xea   : > { %v435_v24 = vpop.f32.mrb[1].mxu0  ;;  %v446_v25 = vadd.f32 %v445_v23, %v340_v21  ;;  %v447_v26 = vpop.f32.mrb[1].mxu1  ;;  %v434_v30 = vadd.f32 %v433_v22, %v330_v20 }
  0xeb   : > { %v448_v27 = vadd.f32 %v447_v26, %v340_v21  ;;  %v436_v31 = vadd.f32 %v435_v24, %v330_v20  ;;  %v603_v26 = vld [vmem:[%s1122_s5 + $0x8] sm:$0xff] }
  0xec   : > { %v460_v34 = vmax.f32 %v446_v25, 0.0  ;;  %v456_v42 = vmax.f32 %v434_v30, 0.0  ;;  %v602_v25 = vld [vmem:[%s1122_s5] sm:$0xff] }
  0xed   : > { %v439_v32 = vpop.f32.mrb[2].mxu0  ;;  %v451_v33 = vpop.f32.mrb[2].mxu1  ;;  %v461_v39 = vmax.f32 %v448_v27, 0.0  ;;  %v457_v45 = vmax.f32 %v436_v31, 0.0  ;;  %v604_v27 = vld [vmem:[%s1122_s5 + $0x10] sm:$0xff] }
  0xee   : > { %v440_v35 = vadd.f32 %v439_v32, %v335_v28  ;;  %v452_v36 = vadd.f32 %v451_v33, %v345_v29  ;;  %v441_v37 = vpop.f32.mrb[3].mxu0  ;;  %v453_v38 = vpop.f32.mrb[3].mxu1 }
  0xef   : > { %v442_v40 = vadd.f32 %v441_v37, %v335_v28  ;;  %v454_v41 = vadd.f32 %v453_v38, %v345_v29  ;;  %v605_v28 = vld [vmem:[%s1122_s5 + $0x18] sm:$0xff]  ;;  %v613_v29 = vpop.permute.xlu0 %612 }
  0xf0   : > { %v458_v43 = vmax.f32 %v440_v35, 0.0  ;;  %v462_v44 = vmax.f32 %v452_v36, 0.0 }
  0xf1   : > { %v459_v46 = vmax.f32 %v442_v40, 0.0  ;;  %v463_v47 = vmax.f32 %v454_v41, 0.0 }
  0xf2   : > { %v863_v48 = vpack.c.bf16 %v458_v43, %v456_v42  ;;  %v867_v49 = vpack.c.bf16 %v462_v44, %v460_v34  ;;  %v618_v34 = vpop.permute.xlu1 %617 }
  0xf3   : > { %v861_v50 = vpack.c.bf16 %v459_v46, %v457_v45  ;;  %v865_v51 = vpack.c.bf16 %v463_v47, %v461_v39  ;;  %v623_v41 = vpop.permute.xlu0 %622 }
  0xf5   : > { %862 = vmatprep.subr.bf16.mxu1 %v861_v50 }
  0xf6   : > { %864 = vmatpush1.bf16.msra.mxu1 %v863_v48  ;;  %v628_v48 = vpop.permute.xlu1 %627 }
  0xf7   : > { %866 = vmatprep.subr.bf16.mxu1 %v865_v51 }
  0xfa   : > { %868 = vmatpush1.bf16.msra.mxu1 %v867_v49 }
  0xfd   : > { %849 = vmatmul.mubr.msk.f32.vlgmr.msra.gmra.mrb[4].mxu1 %vm492_vm2, %v464_v52 }
  0xfe   : > { %575 = vmatprep.mubr.f32.mxu1 %v932_v0 }
 0x101   : > { %850 = vmatmul.mubr.msk.f32.gmra.mrb[6].mxu1 %vm492_vm2, %v465_v53 }
 0x102   : > { %581 = vmatprep.mubr.f32.mxu1 %v932_v0 }
 0x105   : > { %851 = vmatmul.mubr.msk.f32.gmra.mrb[8].mxu1 %vm492_vm2, %v466_v54 }
 0x106   : > { %587 = vmatprep.mubr.f32.mxu1 %v932_v0 }
 0x109   : > { %852 = vmatmul.mubr.msk.f32.gmra.mrb[10].mxu1 %vm492_vm2, %v467_v55 }
 0x1d0   : > { %v571_v56 = vpop.f32.mrb[4].mxu1 }
 0x1d1   : > { %v573_v57 = vpop.f32.mrb[5].mxu1  ;;  %v572_v59 = vadd.f32 %v571_v56, %v475_v58 }
 0x1d2   : > { %v574_v61 = vadd.f32 %v573_v57, %v475_v58 }
 0x1d3   : > { %v594_v3 = vmax.f32 %v572_v59, 0.0 }
 0x1d4   : > { %v577_v62 = vpop.f32.mrb[6].mxu1  ;;  %v595_v5 = vmax.f32 %v574_v61, 0.0 }
 0x1d5   : > { %v578_v63 = vadd.f32 %v577_v62, %v480_v60  ;;  %v579_v1 = vpop.f32.mrb[7].mxu1 }
 0x1d6   : > { %v580_v2 = vadd.f32 %v579_v1, %v480_v60 }
 0x1d7   : > { %v596_v4 = vmax.f32 %v578_v63, 0.0 }
 0x1d8   : > { %v597_v6 = vmax.f32 %v580_v2, 0.0  ;;  %v583_v7 = vpop.f32.mrb[8].mxu1 }
 0x1d9   : > { %v871_v8 = vpack.c.bf16 %v596_v4, %v594_v3  ;;  %v585_v9 = vpop.f32.mrb[9].mxu1  ;;  %v584_v12 = vadd.f32 %v583_v7, %v485_v10 }
 0x1da   : > { %v869_v11 = vpack.c.bf16 %v597_v6, %v595_v5  ;;  %v586_v14 = vadd.f32 %v585_v9, %v485_v10 }
 0x1db   : > { %v598_v19 = vmax.f32 %v584_v12, 0.0 }
 0x1dc   : > { %v589_v15 = vpop.f32.mrb[10].mxu1  ;;  %870 = vmatprep.subr.bf16.mxu0 %v869_v11  ;;  %v599_v21 = vmax.f32 %v586_v14, 0.0 }
 0x1dd   : > { %v590_v16 = vadd.f32 %v589_v15, %v490_v13  ;;  %v591_v17 = vpop.f32.mrb[11].mxu1  ;;  %872 = vmatpush1.bf16.msra.mxu0 %v871_v8 }
 0x1de   : > { %v592_v18 = vadd.f32 %v591_v17, %v490_v13 }
 0x1df   : > { %v600_v20 = vmax.f32 %v590_v16, 0.0 }
 0x1e0   : > { %v601_v22 = vmax.f32 %v592_v18, 0.0 }
 0x1e1   : > { %v875_v23 = vpack.c.bf16 %v600_v20, %v598_v19 }
 0x1e2   : > { %v873_v24 = vpack.c.bf16 %v601_v22, %v599_v21 }
 0x1e4   : > { %874 = vmatprep.subr.bf16.mxu0 %v873_v24 }
 0x1e5   : > { %876 = vmatpush1.bf16.msra.mxu0 %v875_v23 }
 0x1e8   : > { %853 = vmatmul.mubr.msk.f32.vlgmr.msra.gmra.mrb[4].mxu0 %vm492_vm2, %v602_v25 }
 0x1e9   : > { %712 = vmatprep.mubr.f32.mxu0 %v932_v0 }
 0x1ec   : > { %854 = vmatmul.mubr.msk.f32.gmra.mrb[6].mxu0 %vm492_vm2, %v603_v26 }
 0x1ed   : > { %718 = vmatprep.mubr.f32.mxu0 %v932_v0 }
 0x1f0   : > { %855 = vmatmul.mubr.msk.f32.gmra.mrb[8].mxu0 %vm492_vm2, %v604_v27 }
 0x1f1   : > { %724 = vmatprep.mubr.f32.mxu0 %v932_v0 }
 0x1f4   : > { %856 = vmatmul.mubr.msk.f32.gmra.mrb[10].mxu0 %vm492_vm2, %v605_v28 }
 0x2bb   : > { %v708_v30 = vpop.f32.mrb[4].mxu0 }
 0x2bc   : > { %v709_v31 = vadd.f32 %v708_v30, %v613_v29  ;;  %v710_v32 = vpop.f32.mrb[5].mxu0 }
 0x2bd   : > { %v711_v0 = vadd.f32 %v710_v32, %v613_v29 }
 0x2be   : > { %v731_v33 = vmax.f32 %v709_v31, 0.0 }
 0x2bf   : > { %v732_v35 = vmax.f32 %v711_v0, 0.0  ;;  %v714_v36 = vpop.f32.mrb[6].mxu0 }
 0x2c0   : > { %739 = vst [vmem:[%s1098_s22] sm:$0xff] %v731_v33  ;;  %v715_v37 = vadd.f32 %v714_v36, %v618_v34  ;;  %v716_v38 = vpop.f32.mrb[7].mxu0 }
 0x2c1   : > { %740 = vst [vmem:[%s1098_s22 + $0x8] sm:$0xff] %v732_v35  ;;  %v717_v39 = vadd.f32 %v716_v38, %v618_v34 }
 0x2c2   : > { %v733_v40 = vmax.f32 %v715_v37, 0.0 }
 0x2c3   : > { %v734_v42 = vmax.f32 %v717_v39, 0.0  ;;  %v720_v43 = vpop.f32.mrb[8].mxu0 }
 0x2c4   : > { %741 = vst [vmem:[%s1098_s22 + $0x10] sm:$0xff] %v733_v40  ;;  %v721_v44 = vadd.f32 %v720_v43, %v623_v41  ;;  %v722_v45 = vpop.f32.mrb[9].mxu0 }
 0x2c5   : > { %742 = vst [vmem:[%s1098_s22 + $0x18] sm:$0xff] %v734_v42  ;;  %v723_v46 = vadd.f32 %v722_v45, %v623_v41 }
 0x2c6   : > { %v735_v47 = vmax.f32 %v721_v44, 0.0 }
 0x2c7   : > { %v736_v49 = vmax.f32 %v723_v46, 0.0  ;;  %v726_v50 = vpop.f32.mrb[10].mxu0 }
 0x2c8   : > { %743 = vst [vmem:[%s1098_s22 + $0x20] sm:$0xff] %v735_v47  ;;  %v727_v51 = vadd.f32 %v726_v50, %v628_v48  ;;  %v728_v52 = vpop.f32.mrb[11].mxu0 }
 0x2c9   : > { %744 = vst [vmem:[%s1098_s22 + $0x28] sm:$0xff] %v736_v49  ;;  %v729_v53 = vadd.f32 %v728_v52, %v628_v48 }
 0x2ca   : > { %v737_v54 = vmax.f32 %v727_v51, 0.0 }
 0x2cb   : > { %v738_v55 = vmax.f32 %v729_v53, 0.0 }
 0x2cc   : > { %745 = vst [vmem:[%s1098_s22 + $0x30] sm:$0xff] %v737_v54 }
 0x2cd   : > { %746 = vst [vmem:[%s1098_s22 + $0x38] sm:$0xff] %v738_v55 }
 0x2ce PF: > { %s17_s26 = sadd.s32 1, %s930_s26   ;;  %s1125_s24 = smov %s926_s25 }
 0x2cf   : > { %p14_p5 = scmp.ge.s32.totalorder %s17_s26, 4   ;;  %s1126_s25 = smov %s1128_s27 }
 0x2d1   :  { %16 = sbr.rel (!%p14_p5) target bundleno = 2 (0x2), region = 78 }

</bundles_post_ra>
